<compile_context>
chip_gen: v5e
topology: v5e:2x2
jax: 0.10.0
libtpu: 0.0.40
codegen_flags: <defaults>
</compile_context>

<pallas_src>
import functools

import jax
import jax.numpy as jnp
from jax.experimental import pallas as pl
from jax.experimental.pallas import tpu as pltpu


def _round_up(x, m):
    return ((x + m - 1) // m) * m


# --------------------- support = x @ W  (row-tiled, K-tiled reduction) ---------------------
def _xw_kernel(x_ref, w_ref, o_ref, acc_ref):
    k = pl.program_id(1)

    @pl.when(k == 0)
    def _():
        acc_ref[...] = jnp.zeros_like(acc_ref)

    acc_ref[...] += jnp.dot(
        x_ref[...], w_ref[...], preferred_element_type=jnp.float32
    )

    @pl.when(k == pl.num_programs(1) - 1)
    def _():
        o_ref[...] = acc_ref[...].astype(o_ref.dtype)


def _xw(x_bf16, w_bf16, tm):
    n_pad, f_pad = x_bf16.shape
    h_pad = w_bf16.shape[1]
    tkf = min(512, f_pad)  # reduction tile over the feature dim
    return pl.pallas_call(
        _xw_kernel,
        out_shape=jax.ShapeDtypeStruct((n_pad, h_pad), jnp.bfloat16),
        grid_spec=pltpu.PrefetchScalarGridSpec(
            num_scalar_prefetch=0,
            grid=(n_pad // tm, f_pad // tkf),
            in_specs=[
                pl.BlockSpec((tm, tkf), lambda i, k: (i, k)),
                pl.BlockSpec((tkf, h_pad), lambda i, k: (k, 0)),
            ],
            out_specs=pl.BlockSpec((tm, h_pad), lambda i, k: (i, 0)),
            scratch_shapes=[pltpu.VMEM((tm, h_pad), jnp.float32)],
        ),
        compiler_params=pltpu.CompilerParams(
            dimension_semantics=("parallel", "arbitrary"),
        ),
    )(x_bf16, w_bf16)


# ------- layer 1 fused: support2 = relu(adj @ support1 + b1) @ w2  (h never hits HBM) -------
def _agg_relu_proj_kernel(adj_ref, s_ref, b_ref, w2_ref, o_ref, acc_ref):
    k = pl.program_id(1)

    @pl.when(k == 0)
    def _():
        acc_ref[...] = jnp.zeros_like(acc_ref)

    acc_ref[...] += jnp.dot(
        adj_ref[...], s_ref[...], preferred_element_type=jnp.float32
    )

    @pl.when(k == pl.num_programs(1) - 1)
    def _():
        h = jnp.maximum(acc_ref[...] + b_ref[...].astype(jnp.float32), 0.0)
        o_ref[...] = jnp.dot(
            h.astype(jnp.bfloat16), w2_ref[...], preferred_element_type=jnp.float32
        ).astype(o_ref.dtype)


def _agg_relu_proj(adj_bf16, support_bf16, bias_f32, w2_bf16, *, tm, tk):
    n_pad = adj_bf16.shape[0]
    h_pad = support_bf16.shape[1]
    c_pad = w2_bf16.shape[1]
    return pl.pallas_call(
        _agg_relu_proj_kernel,
        out_shape=jax.ShapeDtypeStruct((n_pad, c_pad), jnp.bfloat16),
        grid_spec=pltpu.PrefetchScalarGridSpec(
            num_scalar_prefetch=0,
            grid=(n_pad // tm, n_pad // tk),
            in_specs=[
                pl.BlockSpec((tm, tk), lambda i, k: (i, k)),        # adj stream
                pl.BlockSpec((tk, h_pad), lambda i, k: (k, 0)),     # support1 (width resident)
                pl.BlockSpec((1, h_pad), lambda i, k: (0, 0)),      # bias1 (resident)
                pl.BlockSpec((h_pad, c_pad), lambda i, k: (0, 0)),  # w2 (resident)
            ],
            out_specs=pl.BlockSpec((tm, c_pad), lambda i, k: (i, 0)),
            scratch_shapes=[pltpu.VMEM((tm, h_pad), jnp.float32)],
        ),
        compiler_params=pltpu.CompilerParams(
            dimension_semantics=("parallel", "arbitrary"),
        ),
    )(adj_bf16, support_bf16, bias_f32, w2_bf16)


# ------------- layer 2: out = log_softmax(adj @ support2 + b2), fused finalize -------------
def _agg_logsoftmax_kernel(adj_ref, s_ref, b_ref, o_ref, acc_ref, *, valid_cols):
    k = pl.program_id(1)

    @pl.when(k == 0)
    def _():
        acc_ref[...] = jnp.zeros_like(acc_ref)

    acc_ref[...] += jnp.dot(
        adj_ref[...], s_ref[...], preferred_element_type=jnp.float32
    )

    @pl.when(k == pl.num_programs(1) - 1)
    def _():
        y = acc_ref[...] + b_ref[...].astype(jnp.float32)
        # Mask zero-padded class columns before the row-wise softmax.
        col = jax.lax.broadcasted_iota(jnp.int32, y.shape, 1)
        valid = col < valid_cols
        y = jnp.where(valid, y, jnp.float32(-1e30))
        m = jnp.max(y, axis=1, keepdims=True)
        p = jnp.where(valid, jnp.exp(y - m), 0.0)
        lse = m + jnp.log(jnp.sum(p, axis=1, keepdims=True))
        o_ref[...] = (y - lse).astype(o_ref.dtype)


def _agg_logsoftmax(adj_bf16, support_bf16, bias_f32, *, tm, tk, valid_cols):
    n_pad = adj_bf16.shape[0]
    c_pad = support_bf16.shape[1]
    kernel = functools.partial(_agg_logsoftmax_kernel, valid_cols=valid_cols)
    return pl.pallas_call(
        kernel,
        out_shape=jax.ShapeDtypeStruct((n_pad, c_pad), jnp.float32),
        grid_spec=pltpu.PrefetchScalarGridSpec(
            num_scalar_prefetch=0,
            grid=(n_pad // tm, n_pad // tk),
            in_specs=[
                pl.BlockSpec((tm, tk), lambda i, k: (i, k)),     # adj stream
                pl.BlockSpec((tk, c_pad), lambda i, k: (k, 0)),  # support2
                pl.BlockSpec((1, c_pad), lambda i, k: (0, 0)),   # bias2 (resident)
            ],
            out_specs=pl.BlockSpec((tm, c_pad), lambda i, k: (i, 0)),
            scratch_shapes=[pltpu.VMEM((tm, c_pad), jnp.float32)],
        ),
        compiler_params=pltpu.CompilerParams(
            dimension_semantics=("parallel", "arbitrary"),
        ),
    )(adj_bf16, support_bf16, bias_f32)


# ------------------------------------ wrapper ------------------------------------
def gcn_forward(x, adj, w1, b1, w2, b2):
    n, f = x.shape
    h = w1.shape[1]
    c = w2.shape[1]

    # Lane-dense padding: last dims -> multiples of 128.
    lane = 128
    f_pad = _round_up(f, lane)
    h_pad = _round_up(h, lane)
    c_pad = _round_up(c, lane)

    # Row / reduction tiles: 256 feeds the 256-wide MXU on v6e/v7x; the double-buffered
    # bf16 adj tile (128 KiB) plus the f32 accumulator stay far inside v7x's 64 MiB VMEM.
    if n >= 256:
        tm = tk = 256
    else:
        tm = tk = _round_up(n, 8)
    n_pad = _round_up(n, tm)

    pad2 = lambda a, r, co: jnp.pad(a, ((0, r - a.shape[0]), (0, co - a.shape[1])))

    # bf16 streams (halves adj HBM traffic, doubles MXU rate); accumulation stays f32.
    x_p = pad2(x, n_pad, f_pad).astype(jnp.bfloat16)
    adj_p = pad2(adj, n_pad, n_pad).astype(jnp.bfloat16)
    w1_p = pad2(w1, f_pad, h_pad).astype(jnp.bfloat16)
    w2_p = pad2(w2, h_pad, c_pad).astype(jnp.bfloat16)
    b1_p = pad2(b1, 1, h_pad).astype(jnp.float32)
    b2_p = pad2(b2, 1, c_pad).astype(jnp.float32)

    # ---- Layer 1 support: x @ w1 ----
    support1 = _xw(x_p, w1_p, tm)                                   # (n_pad, h_pad) bf16

    # ---- Fused: relu(adj @ support1 + b1) @ w2  (hidden activation never hits HBM) ----
    # Dropout: module evaluated in inference mode -> identity.
    # TODO(synk): training-mode dropout (pltpu.prng_random_bits mask on h) not implemented.
    support2 = _agg_relu_proj(adj_p, support1, b1_p, w2_p, tm=tm, tk=tk)  # (n_pad, c_pad)

    # ---- Layer 2: out = log_softmax(adj @ support2 + b2, axis=1) ----
    z = _agg_logsoftmax(adj_p, support2, b2_p, tm=tm, tk=tk, valid_cols=c)

    return z[:n, :c]


def init_params(key, nfeat, nhid, nclass):
    # Mirrors GraphConvolution.reset_parameters(): uniform(-stdv, stdv),
    # stdv = 1 / sqrt(out_features), for both weight and bias.
    k1, k2, k3, k4 = jax.random.split(key, 4)
    stdv1 = 1.0 / jnp.sqrt(nhid)
    stdv2 = 1.0 / jnp.sqrt(nclass)
    w1 = jax.random.uniform(k1, (nfeat, nhid), jnp.float32, -stdv1, stdv1)
    b1 = jax.random.uniform(k2, (1, nhid), jnp.float32, -stdv1, stdv1)
    w2 = jax.random.uniform(k3, (nhid, nclass), jnp.float32, -stdv2, stdv2)
    b2 = jax.random.uniform(k4, (1, nclass), jnp.float32, -stdv2, stdv2)
    return w1, b1, w2, b2


def _gcn_reference(x, adj, w1, b1, w2, b2):
    h = jax.nn.relu(adj @ (x @ w1) + b1)
    z = adj @ (h @ w2) + b2
    return jax.nn.log_softmax(z, axis=1)


if __name__ == "__main__":
    key = jax.random.PRNGKey(0)
    N, nfeat, nhid, nclass = 16, 32, 32, 8

    kx, kadj, kparams = jax.random.split(key, 3)
    x = jax.random.normal(kx, (N, nfeat), jnp.float32)

    # Symmetric, row-normalized adjacency with self-loops (typical GCN input).
    a = (jax.random.uniform(kadj, (N, N)) < 0.3).astype(jnp.float32)
    a = jnp.maximum(a, a.T) + jnp.eye(N, dtype=jnp.float32)
    adj = a / jnp.sum(a, axis=1, keepdims=True)

    w1, b1, w2, b2 = init_params(kparams, nfeat, nhid, nclass)

    out = gcn_forward(x, adj, w1, b1, w2, b2)
    jax.block_until_ready(out)

    assert out.shape == (N, nclass)

    # Sanity 1: log_softmax rows exponentiate-sum to 1 (exact in f32 normalization).
    row_sums = jnp.sum(jnp.exp(out), axis=1)
    assert bool(jnp.all(jnp.abs(row_sums - 1.0) < 1e-4))

    # Sanity 2: loose agreement with an f32 pure-JAX reference (inputs streamed as bf16).
    ref = _gcn_reference(x, adj, w1, b1, w2, b2)
    assert bool(jnp.max(jnp.abs(out - ref)) < 0.2)

    print("KERNEL_OK")
</pallas_src>

<mosaic_0001>
module attributes {stable_mosaic.version = 11 : i64} {
  func.func @_xw_kernel(%arg0: i32, %arg1: i32, %arg2: memref<16x128xbf16, #tpu.memory_space<vmem>>, %arg3: memref<128x128xbf16, #tpu.memory_space<vmem>>, %arg4: memref<16x128xbf16, #tpu.memory_space<vmem>>, %arg5: memref<16x128xf32, #tpu.memory_space<vmem>>) attributes {dimension_semantics = [#tpu.dimension_semantics<parallel>, #tpu.dimension_semantics<arbitrary>], iteration_bounds = array<i64: 1, 1>, scalar_prefetch = 0 : i64, scratch_operands = 1 : i64, tpu.core_type = #tpu.core_type<tc>, window_params = [{transform_indices = @transform_0, window_bounds = array<i64: 16, 128>}, {transform_indices = @transform_1, window_bounds = array<i64: 128, 128>}, {transform_indices = @transform_2, window_bounds = array<i64: 16, 128>}]} {
    %c0_i32 = arith.constant 0 : i32
    %0 = arith.cmpi eq, %arg1, %c0_i32 : i32
    %1 = arith.extui %0 : i1 to i32
    %c0_i32_0 = arith.constant 0 : i32
    %2 = arith.cmpi ne, %1, %c0_i32_0 : i32
    scf.if %2 {
      %cst_10 = arith.constant 0.000000e+00 : f32
      %12 = vector.broadcast %cst_10 : f32 to vector<16x128xf32>
      %c0_11 = arith.constant 0 : index
      %c0_12 = arith.constant 0 : index
      %13 = vector.load %arg5[%c0_11, %c0_12] : memref<16x128xf32, #tpu.memory_space<vmem>>, vector<16x128xf32>
      tpu.vector_store %arg5[%c0_11, %c0_12], %12 {strides = array<i32>} : memref<16x128xf32, #tpu.memory_space<vmem>>, vector<16x128xf32>,
    } else {
    }
    %c0 = arith.constant 0 : index
    %c0_1 = arith.constant 0 : index
    %3 = vector.load %arg5[%c0, %c0_1] : memref<16x128xf32, #tpu.memory_space<vmem>>, vector<16x128xf32>
    %c0_2 = arith.constant 0 : index
    %c0_3 = arith.constant 0 : index
    %4 = vector.load %arg2[%c0_2, %c0_3] : memref<16x128xbf16, #tpu.memory_space<vmem>>, vector<16x128xbf16>
    %c0_4 = arith.constant 0 : index
    %c0_5 = arith.constant 0 : index
    %5 = vector.load %arg3[%c0_4, %c0_5] : memref<128x128xbf16, #tpu.memory_space<vmem>>, vector<128x128xbf16>
    %cst = arith.constant dense<0.000000e+00> : vector<16x128xf32>
    %6 = tpu.matmul %4, %5, %cst {dimension_numbers = #tpu.dot_dimension_numbers<[1], [0], [0], [1], [0, 0, 1, 1], [], []>} : vector<16x128xbf16>, vector<128x128xbf16>, vector<16x128xf32> -> vector<16x128xf32>
    %7 = arith.addf %3, %6 : vector<16x128xf32>
    %c0_6 = arith.constant 0 : index
    %c0_7 = arith.constant 0 : index
    %8 = vector.load %arg5[%c0_6, %c0_7] : memref<16x128xf32, #tpu.memory_space<vmem>>, vector<16x128xf32>
    tpu.vector_store %arg5[%c0_6, %c0_7], %7 {strides = array<i32>} : memref<16x128xf32, #tpu.memory_space<vmem>>, vector<16x128xf32>,
    %c0_i32_8 = arith.constant 0 : i32
    %9 = arith.cmpi eq, %arg1, %c0_i32_8 : i32
    %10 = arith.extui %9 : i1 to i32
    %c0_i32_9 = arith.constant 0 : i32
    %11 = arith.cmpi ne, %10, %c0_i32_9 : i32
    scf.if %11 {
      %c0_10 = arith.constant 0 : index
      %c0_11 = arith.constant 0 : index
      %12 = vector.load %arg5[%c0_10, %c0_11] : memref<16x128xf32, #tpu.memory_space<vmem>>, vector<16x128xf32>
      %13 = arith.truncf %12 : vector<16x128xf32> to vector<16x128xbf16>
      %c0_12 = arith.constant 0 : index
      %c0_13 = arith.constant 0 : index
      %14 = vector.load %arg4[%c0_12, %c0_13] : memref<16x128xbf16, #tpu.memory_space<vmem>>, vector<16x128xbf16>
      tpu.vector_store %arg4[%c0_12, %c0_13], %13 {strides = array<i32>} : memref<16x128xbf16, #tpu.memory_space<vmem>>, vector<16x128xbf16>,
    } else {
    }
    return
  }
  func.func @transform_0(%arg0: i32, %arg1: i32) -> (i32, i32) {
    %c0_i32 = arith.constant 0 : i32
    return %arg0, %arg1 : i32, i32
  }
  func.func @transform_1(%arg0: i32, %arg1: i32) -> (i32, i32) {
    %c0_i32 = arith.constant 0 : i32
    %c0_i32_0 = arith.constant 0 : i32
    return %arg1, %c0_i32 : i32, i32
  }
  func.func @transform_2(%arg0: i32, %arg1: i32) -> (i32, i32) {
    %c0_i32 = arith.constant 0 : i32
    %c0_i32_0 = arith.constant 0 : i32
    return %arg0, %c0_i32 : i32, i32
  }
}

</mosaic_0001>

<bundles_post_ra>
// kernel: tpu_custom_call.1
= control target key start
LH: loop header
LB: loop body
LE: loop exit
PB: predicated region body
PF: predicated region fallthrough
CT: control target
= control target key end

     0   :  { %7 = vsyncpa [#allocation4], 0  ;;  %s342_s0 = inlined_call_operand.hbm [shape: bf16[16,128], index: 0, kind: input, shape index: {}]   ;;  %s343_s1 = inlined_call_operand.hbm [shape: bf16[128,128], index: 1, kind: input, shape index: {}]   ;;  %s344_s2 = inlined_call_operand.hbm [shape: bf16[16,128], index: 2, kind: output, shape index: {}]  }
   0x1   :  { %8 = vsyncpa [#allocation7], 0 }
   0x2   :  { %9 = vsyncpa [#allocation5], 0  ;;  %s14_s11 = sshll.u32 %s342_s0, 4  ;;  %s304_s12 = smov [#allocation3]   ;;  %s15_s11 = int_to_ptr.hbm [resolvable:$true] %s14_s11 }
   0x3   :  { %s16_s13 = sshll.u32 %s304_s12, 4  ;;  %s27_s16 = sshll.u32 %s343_s1, 4  ;;  %s17_s13 = int_to_ptr.vmem [resolvable:$true] %s16_s13  ;;  %s28_s16 = int_to_ptr.hbm [resolvable:$true] %s27_s16 }
   0x4   :  { %s305_s17 = smov 64   ;;  %s306_s18 = smov 4  }
   0x5   :  { %22 = dma.hbm_to_vmem [thread:$0]  %s15_s11, 128, %s17_s13, [#allocation4], %s305_s17, %s305_s17, %s306_s18  }
   0x6   :  { %s307_s19 = smov [#allocation6]  }
   0x7   :  { %s29_s20 = sshll.u32 %s307_s19, 4  ;;  %s30_s20 = int_to_ptr.vmem [resolvable:$true] %s29_s20 }
   0x8   :  { %35 = dma.hbm_to_vmem [thread:$0]  %s28_s16, 1024, %s30_s20, [#allocation7], %s305_s17, %s305_s17, %s306_s18  }
   0x9   :  { %298 = dma.done.wait [#allocation4], 128  }
   0xa   :  { %299 = vsyncadd [#allocation4], 4294967168 }
   0xb   :  { %300 = dma.done.wait [#allocation7], 1024  }
   0xc   :  { %301 = vsyncadd [#allocation7], 4294966272  ;;  %v215_v0 = vld [vmem:[#allocation6 + $0x38] sm:$0xff]  ;;  %v214_v1 = vld [vmem:[#allocation6 + $0x30] sm:$0xff]  ;;  %s308_s0 = smov [#allocation8]   ;;  %s157_s23 = sshll.u32 %s344_s2, 4  ;;  %s158_s23 = int_to_ptr.hbm [resolvable:$true] %s157_s23 }
   0xd   :  { %124 = vmatpush.bf16.msra.mxu0 %v215_v0  ;;  %v213_v2 = vld [vmem:[#allocation6 + $0x28] sm:$0xff]  ;;  %v212_v3 = vld [vmem:[#allocation6 + $0x20] sm:$0xff]  ;;  %v211_v4 = vld [vmem:[#allocation6 + $0x18] sm:$0xff]  ;;  %s155_s1 = sshll.u32 %s308_s0, 4  ;;  %s156_s1 = int_to_ptr.vmem [resolvable:$true] %s155_s1 }
   0xe   :  { %v210_v5 = vld [vmem:[#allocation6 + $0x10] sm:$0xff]  ;;  %v209_v6 = vld [vmem:[#allocation6 + $0x8] sm:$0xff]  ;;  %v208_v7 = vld [vmem:[#allocation6] sm:$0xff] }
   0xf   :  { %v207_v8 = vld [vmem:[#allocation3] sm:$0xff] }
  0x11   :  { %125 = vmatpush.bf16.msra.mxu0 %v214_v1 }
  0x15   :  { %126 = vmatpush.bf16.msra.mxu0 %v213_v2 }
  0x19   :  { %127 = vmatpush.bf16.msra.mxu0 %v212_v3 }
  0x1d   :  { %128 = vmatpush.bf16.msra.mxu0 %v211_v4 }
  0x21   :  { %129 = vmatpush.bf16.msra.mxu0 %v210_v5 }
  0x25   :  { %130 = vmatpush.bf16.msra.mxu0 %v209_v6 }
  0x29   :  { %131 = vmatpush.bf16.msra.mxu0 %v208_v7 }
  0x2c   :  { %132 = vmatmul.bf16.vlgmr.msra.gmra.mxu0 %v207_v8 }
  0xa9   :  { %v133_v9 = vpop.f32.mrf.mxu0 }
  0xb1   :  { %v135_v10 = vpop.f32.mrf.mxu0 }
  0xb2   :  { %v219_v11 = vpack.c.bf16 %v135_v10, %v133_v9 }
  0xb4   :  { %220 = vst [vmem:[#allocation8] sm:$0xff] %v219_v11  }
  0xb5   :  { %163 = dma.vmem_to_hbm [thread:$0]  %s156_s1, 128, %s158_s23, [#allocation5], %s305_s17, %s305_s17, %s306_s18  }
  0xb6   :  { %302 = dma.done.wait [#allocation5], 128  }
  0xb7   :  { %303 = vsyncadd [#allocation5], 4294967168 }
  0xb8   :  { %168 = vsyncpa [#allocation4], 1 }
  0xb9   :  { %169 = vsyncpa [#allocation7], 1 }
  0xba   :  { %170 = vsyncpa [#allocation5], 1 }

</bundles_post_ra>
